<compile_context>
chip_gen: v5e
topology: v5e:2x2
jax: 0.10.0
libtpu: 0.0.40
codegen_flags: <defaults>
</compile_context>

<pallas_src>
import functools

import jax
import jax.numpy as jnp
from jax.experimental import pallas as pl
from jax.experimental.pallas import tpu as pltpu

LANE = 128


def _round_up(n, m):
    return ((n + m - 1) // m) * m


def _mlp_kernel(x_ref, w1_ref, b1_ref, w2_ref, b2_ref, w3_ref, b3_ref, o_ref):
    # x arrives as f32; cast to bf16 in-kernel (free VPU work in a DMA-bound kernel)
    x = x_ref[...].astype(jnp.bfloat16)
    # fc1 + ReLU  (bf16 x bf16 -> f32 accumulate on the MXU)
    h1 = jnp.dot(x, w1_ref[...], preferred_element_type=jnp.float32)
    h1 = jnp.maximum(h1 + b1_ref[...], 0.0)
    # fc2 + ReLU
    h2 = jnp.dot(h1.astype(jnp.bfloat16), w2_ref[...],
                 preferred_element_type=jnp.float32)
    h2 = jnp.maximum(h2 + b2_ref[...], 0.0)
    # dropout (eval mode) == identity
    # fc3 -- narrow (tb, n_out) result; only the real outputs hit HBM
    out = jnp.dot(h2.astype(jnp.bfloat16), w3_ref[...],
                  preferred_element_type=jnp.float32)
    o_ref[...] = (out + b3_ref[...]).astype(o_ref.dtype)


def prepare_params(params):
    """One-time pad/cast of the weights: hidden padded to 128 lanes (bf16),
    fc3/bias kept at the true n_out width so the output stream stays narrow."""
    w1, b1 = params["w1"], params["b1"]
    w2, b2 = params["w2"], params["b2"]
    w3, b3 = params["w3"], params["b3"]
    n_in, hidden = w1.shape
    n_out = w3.shape[1]
    h_pad = _round_up(hidden, LANE)

    bf16 = jnp.bfloat16
    f32 = jnp.float32
    w1p = jnp.zeros((n_in, h_pad), bf16).at[:, :hidden].set(w1.astype(bf16))
    w2p = jnp.zeros((h_pad, h_pad), bf16).at[:hidden, :hidden].set(w2.astype(bf16))
    w3p = jnp.zeros((h_pad, n_out), bf16).at[:hidden, :].set(w3.astype(bf16))
    b1p = jnp.zeros((1, h_pad), f32).at[:, :hidden].set(b1.astype(f32))
    b2p = jnp.zeros((1, h_pad), f32).at[:, :hidden].set(b2.astype(f32))
    b3p = b3.astype(f32).reshape(1, n_out)
    return {"w1": w1p, "b1": b1p, "w2": w2p, "b2": b2p, "w3": w3p, "b3": b3p,
            "n_in": n_in, "hidden": hidden, "h_pad": h_pad, "n_out": n_out}


def net_forward(x, prep, *, block_b=4096):
    """x: [B, n_input] float32; prep: output of prepare_params."""
    B, n_in = x.shape
    assert n_in == prep["n_in"], "input width mismatch"
    h_pad, n_out = prep["h_pad"], prep["n_out"]
    w1p, b1p = prep["w1"], prep["b1"]
    w2p, b2p = prep["w2"], prep["b2"]
    w3p, b3p = prep["w3"], prep["b3"]

    # Batch tile: multiple of 8, at most block_b, and capped so the "parallel"
    # batch axis has >= 2 grid steps whenever B > 8 (keeps both v7x TCs busy;
    # harmless on single-TC v5e/v6e).  Ragged final tile handled by Pallas.
    tb = min(_round_up(block_b, 8), max(8, _round_up(pl.cdiv(B, 2), 8)))
    grid = (pl.cdiv(B, tb),)

    # VMEM footprint: double-buffered x/out tiles + resident weights + slack
    # for the (tb, h_pad) f32 intermediates.
    vmem_bytes = (
        2 * tb * n_in * 4
        + 2 * tb * n_out * 4
        + 2 * (w1p.size + w2p.size + w3p.size) * 2
        + 2 * (b1p.size + b2p.size + b3p.size) * 4
        + 4 * tb * h_pad * 4
    )
    vmem_limit = int(min(64 * 1024 * 1024, max(16 * 1024 * 1024, 2 * vmem_bytes)))

    flops = 2 * B * (n_in * h_pad + h_pad * h_pad + h_pad * n_out)
    bytes_accessed = (
        B * n_in * 4 + B * n_out * 4
        + (w1p.size + w2p.size + w3p.size) * 2
        + (b1p.size + b2p.size + b3p.size) * 4
    )

    out = pl.pallas_call(
        _mlp_kernel,
        out_shape=jax.ShapeDtypeStruct((B, n_out), jnp.float32),
        grid=grid,
        in_specs=[
            pl.BlockSpec((tb, n_in), lambda i: (i, 0)),      # x: tiled over batch (f32)
            pl.BlockSpec((n_in, h_pad), lambda i: (0, 0)),   # weights: VMEM-resident
            pl.BlockSpec((1, h_pad), lambda i: (0, 0)),
            pl.BlockSpec((h_pad, h_pad), lambda i: (0, 0)),
            pl.BlockSpec((1, h_pad), lambda i: (0, 0)),
            pl.BlockSpec((h_pad, n_out), lambda i: (0, 0)),
            pl.BlockSpec((1, n_out), lambda i: (0, 0)),
        ],
        out_specs=pl.BlockSpec((tb, n_out), lambda i: (i, 0)),
        compiler_params=pltpu.CompilerParams(
            dimension_semantics=("parallel",),
            vmem_limit_bytes=vmem_limit),
        cost_estimate=pl.CostEstimate(
            flops=flops, transcendentals=0, bytes_accessed=bytes_accessed),
    )(x.astype(jnp.float32), w1p, b1p, w2p, b2p, w3p, b3p)

    return out


def init_params(key, n_input, n_output, hidden=64):
    """Deterministic init mimicking nn.Linear's U(-1/sqrt(fan_in), 1/sqrt(fan_in))."""
    ks = jax.random.split(key, 6)

    def linear(kw, kb, fan_in, fan_out):
        bound = 1.0 / jnp.sqrt(jnp.float32(fan_in))
        w = jax.random.uniform(kw, (fan_in, fan_out), jnp.float32, -bound, bound)
        b = jax.random.uniform(kb, (1, fan_out), jnp.float32, -bound, bound)
        return w, b

    w1, b1 = linear(ks[0], ks[1], n_input, hidden)
    w2, b2 = linear(ks[2], ks[3], hidden, hidden)
    w3, b3 = linear(ks[4], ks[5], hidden, n_output)
    return {"w1": w1, "b1": b1, "w2": w2, "b2": b2, "w3": w3, "b3": b3}


def reference_forward(x, params):
    """Pure-JAX reference emulating the kernel's bf16-input / f32-accumulate matmuls."""
    bf = lambda a: a.astype(jnp.bfloat16).astype(jnp.float32)
    dot = functools.partial(jnp.dot, precision=jax.lax.Precision.HIGHEST)
    h1 = jnp.maximum(dot(bf(x), bf(params["w1"])) + params["b1"], 0.0)
    h2 = jnp.maximum(dot(bf(h1), bf(params["w2"])) + params["b2"], 0.0)
    return dot(bf(h2), bf(params["w3"])) + params["b3"]


if __name__ == "__main__":
    key = jax.random.PRNGKey(0)
    k_param, k_x1, k_x2 = jax.random.split(key, 3)

    n_input, n_output = 32, 8
    params = init_params(k_param, n_input, n_output)
    prep = prepare_params(params)   # one-time pad/cast, hoisted out of the call

    # Small case (single grid step).
    batch = 8
    x = jax.random.normal(k_x1, (batch, n_input), jnp.float32)
    out = jax.block_until_ready(net_forward(x, prep))
    ref = reference_forward(x, params)
    assert out.shape == (batch, n_output)
    assert jnp.allclose(out, ref, atol=2e-3, rtol=2e-3), "mismatch vs reference (B=8)"

    # Larger case exercising the 2-step batch grid + ragged final tile.
    batch2 = 300
    x2 = jax.random.normal(k_x2, (batch2, n_input), jnp.float32)
    out2 = jax.block_until_ready(net_forward(x2, prep))
    ref2 = reference_forward(x2, params)
    assert out2.shape == (batch2, n_output)
    assert jnp.allclose(out2, ref2, atol=2e-3, rtol=2e-3), "mismatch vs reference (B=300)"

    print("KERNEL_OK")
</pallas_src>

<mosaic_0001>
module attributes {stable_mosaic.version = 11 : i64} {
  func.func @_mlp_kernel(%arg0: i32, %arg1: memref<8x32xf32, #tpu.memory_space<vmem>>, %arg2: memref<32x128xbf16, #tpu.memory_space<vmem>>, %arg3: memref<1x128xf32, #tpu.memory_space<vmem>>, %arg4: memref<128x128xbf16, #tpu.memory_space<vmem>>, %arg5: memref<1x128xf32, #tpu.memory_space<vmem>>, %arg6: memref<128x8xbf16, #tpu.memory_space<vmem>>, %arg7: memref<1x8xf32, #tpu.memory_space<vmem>>, %arg8: memref<8x8xf32, #tpu.memory_space<vmem>>) attributes {dimension_semantics = [#tpu.dimension_semantics<parallel>], iteration_bounds = array<i64: 1>, scalar_prefetch = 0 : i64, scratch_operands = 0 : i64, tpu.core_type = #tpu.core_type<tc>, window_params = [{transform_indices = @transform_0, window_bounds = array<i64: 8, 32>}, {pipeline_mode = #tpu.pipeline_mode<synchronous>, transform_indices = @transform_1, window_bounds = array<i64: 32, 128>}, {pipeline_mode = #tpu.pipeline_mode<synchronous>, transform_indices = @transform_2, window_bounds = array<i64: 1, 128>}, {pipeline_mode = #tpu.pipeline_mode<synchronous>, transform_indices = @transform_3, window_bounds = array<i64: 128, 128>}, {pipeline_mode = #tpu.pipeline_mode<synchronous>, transform_indices = @transform_4, window_bounds = array<i64: 1, 128>}, {pipeline_mode = #tpu.pipeline_mode<synchronous>, transform_indices = @transform_5, window_bounds = array<i64: 128, 8>}, {pipeline_mode = #tpu.pipeline_mode<synchronous>, transform_indices = @transform_6, window_bounds = array<i64: 1, 8>}, {transform_indices = @transform_7, window_bounds = array<i64: 8, 8>}]} {
    %c0 = arith.constant 0 : index
    %c0_0 = arith.constant 0 : index
    %0 = vector.load %arg1[%c0, %c0_0] : memref<8x32xf32, #tpu.memory_space<vmem>>, vector<8x32xf32>
    %1 = arith.truncf %0 : vector<8x32xf32> to vector<8x32xbf16>
    %c0_1 = arith.constant 0 : index
    %c0_2 = arith.constant 0 : index
    %2 = vector.load %arg2[%c0_1, %c0_2] : memref<32x128xbf16, #tpu.memory_space<vmem>>, vector<32x128xbf16>
    %cst = arith.constant dense<0.000000e+00> : vector<8x128xf32>
    %3 = tpu.matmul %1, %2, %cst {dimension_numbers = #tpu.dot_dimension_numbers<[1], [0], [0], [1], [0, 0, 1, 1], [], []>} : vector<8x32xbf16>, vector<32x128xbf16>, vector<8x128xf32> -> vector<8x128xf32>
    %c0_3 = arith.constant 0 : index
    %c0_4 = arith.constant 0 : index
    %4 = vector.load %arg3[%c0_3, %c0_4] : memref<1x128xf32, #tpu.memory_space<vmem>>, vector<1x128xf32>
    %5 = vector.broadcast %4 : vector<1x128xf32> to vector<8x128xf32>
    %6 = arith.addf %3, %5 : vector<8x128xf32>
    %cst_5 = arith.constant 0.000000e+00 : f32
    %7 = vector.broadcast %cst_5 : f32 to vector<8x128xf32>
    %8 = arith.maximumf %6, %7 : vector<8x128xf32>
    %9 = arith.truncf %8 : vector<8x128xf32> to vector<8x128xbf16>
    %c0_6 = arith.constant 0 : index
    %c0_7 = arith.constant 0 : index
    %10 = vector.load %arg4[%c0_6, %c0_7] : memref<128x128xbf16, #tpu.memory_space<vmem>>, vector<128x128xbf16>
    %cst_8 = arith.constant dense<0.000000e+00> : vector<8x128xf32>
    %11 = tpu.matmul %9, %10, %cst_8 {dimension_numbers = #tpu.dot_dimension_numbers<[1], [0], [0], [1], [0, 0, 1, 1], [], []>} : vector<8x128xbf16>, vector<128x128xbf16>, vector<8x128xf32> -> vector<8x128xf32>
    %c0_9 = arith.constant 0 : index
    %c0_10 = arith.constant 0 : index
    %12 = vector.load %arg5[%c0_9, %c0_10] : memref<1x128xf32, #tpu.memory_space<vmem>>, vector<1x128xf32>
    %13 = vector.broadcast %12 : vector<1x128xf32> to vector<8x128xf32>
    %14 = arith.addf %11, %13 : vector<8x128xf32>
    %cst_11 = arith.constant 0.000000e+00 : f32
    %15 = vector.broadcast %cst_11 : f32 to vector<8x128xf32>
    %16 = arith.maximumf %14, %15 : vector<8x128xf32>
    %17 = arith.truncf %16 : vector<8x128xf32> to vector<8x128xbf16>
    %c0_12 = arith.constant 0 : index
    %c0_13 = arith.constant 0 : index
    %18 = vector.load %arg6[%c0_12, %c0_13] : memref<128x8xbf16, #tpu.memory_space<vmem>>, vector<128x8xbf16>
    %cst_14 = arith.constant dense<0.000000e+00> : vector<8x8xf32>
    %19 = tpu.matmul %17, %18, %cst_14 {dimension_numbers = #tpu.dot_dimension_numbers<[1], [0], [0], [1], [0, 0, 1, 1], [], []>} : vector<8x128xbf16>, vector<128x8xbf16>, vector<8x8xf32> -> vector<8x8xf32>
    %c0_15 = arith.constant 0 : index
    %c0_16 = arith.constant 0 : index
    %20 = vector.load %arg7[%c0_15, %c0_16] : memref<1x8xf32, #tpu.memory_space<vmem>>, vector<1x8xf32>
    %21 = vector.broadcast %20 : vector<1x8xf32> to vector<8x8xf32>
    %22 = arith.addf %19, %21 : vector<8x8xf32>
    %c0_17 = arith.constant 0 : index
    %c0_18 = arith.constant 0 : index
    %23 = vector.load %arg8[%c0_17, %c0_18] : memref<8x8xf32, #tpu.memory_space<vmem>>, vector<8x8xf32>
    tpu.vector_store %arg8[%c0_17, %c0_18], %22 {strides = array<i32>} : memref<8x8xf32, #tpu.memory_space<vmem>>, vector<8x8xf32>,
    return
  }
  func.func @transform_0(%arg0: i32) -> (i32, i32) {
    %c0_i32 = arith.constant 0 : i32
    %c0_i32_0 = arith.constant 0 : i32
    return %arg0, %c0_i32 : i32, i32
  }
  func.func @transform_1(%arg0: i32) -> (i32, i32) {
    %c0_i32 = arith.constant 0 : i32
    %c0_i32_0 = arith.constant 0 : i32
    %c0_i32_1 = arith.constant 0 : i32
    return %c0_i32, %c0_i32_0 : i32, i32
  }
  func.func @transform_2(%arg0: i32) -> (i32, i32) {
    %c0_i32 = arith.constant 0 : i32
    %c0_i32_0 = arith.constant 0 : i32
    %c0_i32_1 = arith.constant 0 : i32
    return %c0_i32, %c0_i32_0 : i32, i32
  }
  func.func @transform_3(%arg0: i32) -> (i32, i32) {
    %c0_i32 = arith.constant 0 : i32
    %c0_i32_0 = arith.constant 0 : i32
    %c0_i32_1 = arith.constant 0 : i32
    return %c0_i32, %c0_i32_0 : i32, i32
  }
  func.func @transform_4(%arg0: i32) -> (i32, i32) {
    %c0_i32 = arith.constant 0 : i32
    %c0_i32_0 = arith.constant 0 : i32
    %c0_i32_1 = arith.constant 0 : i32
    return %c0_i32, %c0_i32_0 : i32, i32
  }
  func.func @transform_5(%arg0: i32) -> (i32, i32) {
    %c0_i32 = arith.constant 0 : i32
    %c0_i32_0 = arith.constant 0 : i32
    %c0_i32_1 = arith.constant 0 : i32
    return %c0_i32, %c0_i32_0 : i32, i32
  }
  func.func @transform_6(%arg0: i32) -> (i32, i32) {
    %c0_i32 = arith.constant 0 : i32
    %c0_i32_0 = arith.constant 0 : i32
    %c0_i32_1 = arith.constant 0 : i32
    return %c0_i32, %c0_i32_0 : i32, i32
  }
  func.func @transform_7(%arg0: i32) -> (i32, i32) {
    %c0_i32 = arith.constant 0 : i32
    %c0_i32_0 = arith.constant 0 : i32
    return %arg0, %c0_i32 : i32, i32
  }
}

</mosaic_0001>

<bundles_post_ra>
// kernel: tpu_custom_call.1
= control target key start
LH: loop header
LB: loop body
LE: loop exit
PB: predicated region body
PF: predicated region fallthrough
CT: control target
= control target key end

     0   :  { %12 = vsyncpa [#allocation3], 0  ;;  %s571_s0 = inlined_call_operand.hbm [shape: f32[8,32], index: 0, kind: input, shape index: {}]   ;;  %s572_s1 = inlined_call_operand.hbm [shape: bf16[32,128], index: 1, kind: input, shape index: {}]   ;;  %s573_s2 = inlined_call_operand.vmem [shape: f32[1,128], index: 2, kind: input, shape index: {}]   ;;  %s574_s3 = inlined_call_operand.vmem [shape: bf16[128,128], index: 3, kind: input, shape index: {}]   ;;  %s575_s4 = inlined_call_operand.vmem [shape: f32[1,128], index: 4, kind: input, shape index: {}]   ;;  %s576_s5 = inlined_call_operand.vmem [shape: bf16[128,8], index: 5, kind: input, shape index: {}]   ;;  %s577_s6 = inlined_call_operand.vmem [shape: f32[1,8], index: 6, kind: input, shape index: {}]   ;;  %s578_s7 = inlined_call_operand.hbm [shape: f32[8,8], index: 7, kind: output, shape index: {}]  }
   0x1   :  { %13 = vsyncpa [#allocation6], 0 }
   0x2   :  { %14 = vsyncpa [#allocation4], 0  ;;  %s20_s26 = sshll.u32 %s571_s0, 4  ;;  %s460_s27 = smov [#allocation2]   ;;  %s21_s26 = int_to_ptr.hbm [resolvable:$true] %s20_s26 }
   0x3   :  { %s22_s28 = sshll.u32 %s460_s27, 4  ;;  %s30_s8 = sshll.u32 %s572_s1, 4  ;;  %s23_s28 = int_to_ptr.vmem [resolvable:$true] %s22_s28  ;;  %s31_s8 = int_to_ptr.hbm [resolvable:$true] %s30_s8 }
   0x4   :  { %25 = dma.hbm_to_vmem [thread:$0]  %s21_s26, 128, %s23_s28, [#allocation3]  }
   0x5   :  { %s461_s9 = smov [#allocation5]   ;;  %s462_s11 = smov 64  }
   0x6   :  { %s32_s10 = sshll.u32 %s461_s9, 4  ;;  %s463_s12 = smov 4   ;;  %s33_s10 = int_to_ptr.vmem [resolvable:$true] %s32_s10 }
   0x7   :  { %38 = dma.hbm_to_vmem [thread:$0]  %s31_s8, 256, %s33_s10, [#allocation6], %s462_s11, %s462_s11, %s463_s12  }
   0x8   :  { %454 = dma.done.wait [#allocation3], 128  }
   0x9   :  { %455 = vsyncadd [#allocation3], 4294967168 }
   0xa   :  { %456 = dma.done.wait [#allocation6], 256  }
   0xb   :  { %457 = vsyncadd [#allocation6], 4294967040  ;;  %v357_v0 = vld [vmem:[#allocation5 + $0x8] sm:$0xff]  ;;  %v365_v1 = vld [vmem:[%s574_s3 + $0x38] sm:$0xff]  ;;  %vm80_vm0 = vcmask 261120   ;;  %s464_s22 = smov [#allocation7]  }
   0xc   :  { %90 = vmatpush.bf16.msra.mxu0 %v357_v0  ;;  %v356_v2 = vld [vmem:[#allocation5] sm:$0xff]  ;;  %v58_v3 = vld [vmem:[#allocation2] sm:$0xff]  ;;  %167 = vmatpush.bf16.msra.mxu1 %v365_v1  ;;  %v364_v4 = vld [vmem:[%s574_s3 + $0x30] sm:$0xff]  ;;  %s270_s23 = sshll.u32 %s464_s22, 4  ;;  %vm263_vm1 = vcmask 64512   ;;  %s271_s23 = int_to_ptr.vmem [resolvable:$true] %s270_s23 }
   0xd   :  { %v59_v5 = vpack.c.bf16 %v58_v3, %v58_v3  ;;  %v363_v6 = vld [vmem:[%s574_s3 + $0x28] sm:$0xff]  ;;  %v362_v7 = vld [vmem:[%s574_s3 + $0x20] sm:$0xff]  ;;  %v361_v8 = vld [vmem:[%s574_s3 + $0x18] sm:$0xff] }
   0xe   :  { %v360_v9 = vld [vmem:[%s574_s3 + $0x10] sm:$0xff]  ;;  %v359_v10 = vld [vmem:[%s574_s3 + $0x8] sm:$0xff]  ;;  %v358_v11 = vld [vmem:[%s574_s3] sm:$0xff] }
   0xf   :  { %v373_v12 = vld [vmem:[%s576_s5 + $0x38] sm:$0xff]  ;;  %v372_v13 = vld [vmem:[%s576_s5 + $0x30] sm:$0xff]  ;;  %v371_v14 = vld [vmem:[%s576_s5 + $0x28] sm:$0xff] }
  0x10   :  { %91 = vmatpush.bf16.msra.mxu0 %v356_v2  ;;  %168 = vmatpush.bf16.msra.mxu1 %v364_v4  ;;  %v370_v15 = vld [vmem:[%s576_s5 + $0x20] sm:$0xff]  ;;  %v369_v16 = vld [vmem:[%s576_s5 + $0x18] sm:$0xff]  ;;  %v368_v17 = vld [vmem:[%s576_s5 + $0x10] sm:$0xff] }
  0x11   :  { %250 = vmatpush.bf16.msra.mxu2 %v373_v12  ;;  %v379_v18 = vld [vmem:[%s573_s2] ss:$0 sm:$0xff]  ;;  %v367_v24 = vld [vmem:[%s576_s5 + $0x8] sm:$0xff] }
  0x12   :  { %v366_v25 = vld [vmem:[%s576_s5] sm:$0xff]  ;;  %s272_s5 = sshll.u32 %s578_s7, 4  ;;  %s273_s5 = int_to_ptr.hbm [resolvable:$true] %s272_s5 }
  0x13   :  { %291 = vmatmul.msk.bf16.vlgmr.msra.gmra.mxu0 %vm80_vm0, %v59_v5  ;;  %v380_v26 = vld [vmem:[%s575_s4] ss:$0 sm:$0xff] }
  0x14   :  { %169 = vmatpush.bf16.msra.mxu1 %v363_v6  ;;  %v381_v32 = vld [vmem:[%s577_s6] ss:$0 sm:$0xff] }
  0x15   :  { %251 = vmatpush.bf16.msra.mxu2 %v372_v13 }
  0x18   :  { %170 = vmatpush.bf16.msra.mxu1 %v362_v7 }
  0x19   :  { %252 = vmatpush.bf16.msra.mxu2 %v371_v14 }
  0x1c   :  { %171 = vmatpush.bf16.msra.mxu1 %v361_v8 }
  0x1d   :  { %253 = vmatpush.bf16.msra.mxu2 %v370_v15 }
  0x20   :  { %172 = vmatpush.bf16.msra.mxu1 %v360_v9 }
  0x21   :  { %254 = vmatpush.bf16.msra.mxu2 %v369_v16 }
  0x24   :  { %173 = vmatpush.bf16.msra.mxu1 %v359_v10 }
  0x25   :  { %255 = vmatpush.bf16.msra.mxu2 %v368_v17 }
  0x28   :  { %174 = vmatpush.bf16.msra.mxu1 %v358_v11 }
  0x29   :  { %256 = vmatpush.bf16.msra.mxu2 %v367_v24 }
  0x2d   :  { %257 = vmatpush.bf16.msra.mxu2 %v366_v25 }
  0x90   :  { %v93_v19 = vpop.f32.mrf.mxu0 }
  0x91   :  { %v94_v20 = vadd.f32 %v379_v18, %v93_v19 }
  0x93   :  { %v97_v21 = vmax.f32 %v94_v20, 0.0 }
  0x95   :  { %v98_v22 = vpack.c.bf16 %v97_v21, %v97_v21 }
  0x97   :  { %175 = vmatmul.bf16.vlgmr.msra.gmra.mxu1 %v98_v22 }
  0x98   :  { %v95_v23 = vpop.f32.mrf.mxu0 }
 0x114   :  { %v176_v27 = vpop.f32.mrf.mxu1 }
 0x115   :  { %v177_v28 = vadd.f32 %v380_v26, %v176_v27 }
 0x117   :  { %v180_v29 = vmax.f32 %v177_v28, 0.0 }
 0x119   :  { %v181_v30 = vpack.c.bf16 %v180_v29, %v180_v29 }
 0x11b   :  { %258 = vmatmul.bf16.vlgmr.msra.gmra.mxu2 %v181_v30 }
 0x11c   :  { %v178_v31 = vpop.f32.mrf.mxu1 }
 0x19e   :  { %v259_v33 = vpop.f32.mrf.mxu2 }
 0x19f   :  { %v260_v34 = vadd.f32 %v381_v32, %v259_v33 }
 0x1a1   :  { %264 = vst.msk [vmem:[#allocation7] sm:$0xff] %vm263_vm1, %v260_v34 }
 0x1a2   :  { %275 = dma.vmem_to_hbm [thread:$0]  %s271_s23, 128, %s273_s5, [#allocation4]  }
 0x1a6   :  { %v261_v35 = vpop.f32.mrf.mxu2 }
 0x1a7   :  { %458 = dma.done.wait [#allocation4], 128  }
 0x1a8   :  { %459 = vsyncadd [#allocation4], 4294967168 }
 0x1a9   :  { %280 = vsyncpa [#allocation3], 1 }
 0x1aa   :  { %281 = vsyncpa [#allocation6], 1 }
 0x1ab   :  { %282 = vsyncpa [#allocation4], 1 }

</bundles_post_ra>
